<compile_context>
chip_gen: v5e
topology: v5e:2x2
jax: 0.10.0
libtpu: 0.0.40
codegen_flags: <defaults>
</compile_context>

<pallas_src>
import math

import jax
import jax.numpy as jnp
from jax import lax
from jax.experimental import pallas as pl
from jax.experimental.pallas import tpu as pltpu


def gcn_kernel(x_ref, w_ref, adj_ref, o_ref):
    """Fused multi-head GCN: support = x @ W ; out = D (A+I) D @ support,
    with D = diag(rowsum(A+I)^-1/2) (inf -> 0), computed without materializing A+I."""
    B, H, N, Fin = x_ref.shape
    Fout = w_ref.shape[-1]
    G = B * H

    x = x_ref[...].astype(jnp.float32)                      # (B, H, N, Fin)
    # Merge the leading (B, H) dims -> batched group axis; lane/sublane dims untouched.
    adj = adj_ref[...].astype(jnp.float32).reshape(G, N, N)  # (G, N, N)

    # Degree of A_hat = A + I without building I:  rowsum(A_hat) = rowsum(A) + 1.
    deg = jnp.sum(adj, axis=-1, keepdims=True) + 1.0        # (G, N, 1)
    d = lax.rsqrt(deg)                                      # single EUP rsqrt
    d = jnp.where(jnp.isinf(d), 0.0, d)                     # matches D[D == inf] = 0

    # Projection: statically unrolled head loop, B folded into the matmul M dimension
    # (M = B*N rows) -> only H MXU pushes.
    support = jnp.stack(
        [jnp.dot(x[:, h].reshape(B * N, Fin),
                 w_ref[h].astype(jnp.float32),
                 preferred_element_type=jnp.float32).reshape(B, N, Fout)
         for h in range(H)],
        axis=1,                                             # (B, H, N, Fout)
    ).reshape(G, N, Fout)

    # (D A_hat D) @ s  ==  d * (A_hat @ (d*s))  ==  d * (A @ y + y),  y = d*s
    y = d * support                                         # (G, N, Fout)
    prop = jnp.einsum("gnm,gmf->gnf", adj, y,
                      preferred_element_type=jnp.float32) + y
    out = (d * prop).reshape(B, H, N, Fout)

    o_ref[...] = out.astype(o_ref.dtype)                    # one full-tile store


def graph_convolution(x, weight, adj):
    """x: (B,H,N,Fin), weight: (H,Fin,Fout), adj: (B,H,N,N) -> (B,H,N,Fout)."""
    B, H, N, Fin = x.shape
    Fout = weight.shape[-1]
    itemsize = jnp.dtype(x.dtype).itemsize
    flops = 2 * B * H * N * Fout * (Fin + N)                # x@W + adjacency propagation
    bytes_accessed = itemsize * (x.size + weight.size + adj.size + B * H * N * Fout)

    return pl.pallas_call(
        gcn_kernel,
        out_shape=jax.ShapeDtypeStruct((B, H, N, Fout), x.dtype),
        grid=(1,),  # single step: whole problem lives in VMEM; no per-step overhead
        in_specs=[
            pl.BlockSpec((B, H, N, Fin), lambda i: (0, 0, 0, 0)),
            pl.BlockSpec((H, Fin, Fout), lambda i: (0, 0, 0)),
            pl.BlockSpec((B, H, N, N), lambda i: (0, 0, 0, 0)),
        ],
        out_specs=pl.BlockSpec((B, H, N, Fout), lambda i: (0, 0, 0, 0)),
        cost_estimate=pl.CostEstimate(
            flops=flops,
            transcendentals=B * H * N,                      # rsqrt per node
            bytes_accessed=int(bytes_accessed),
        ),
        compiler_params=pltpu.CompilerParams(
            dimension_semantics=("arbitrary",)),
    )(x, weight, adj)


def reference_forward(x, weight, adj):
    """Plain-JAX reference mirroring the PyTorch forward exactly."""
    support = jnp.einsum("bhnf,hfo->bhno", x, weight)
    n = adj.shape[-1]
    adj_hat = adj + jnp.eye(n, dtype=adj.dtype)
    d = jnp.sum(adj_hat, axis=-1) ** (-0.5)
    d = jnp.where(jnp.isinf(d), 0.0, d)
    D = jnp.einsum("bhn,nm->bhnm", d, jnp.eye(n, dtype=adj.dtype))
    norm_adj = D @ adj_hat @ D
    return norm_adj @ support


if __name__ == "__main__":
    # Module config: in_features=32, head_num=2, out_features=32,
    # image_size=16, patch_size=4  ->  per-head Fin=16, Fout=16.
    # NOTE: image_size / patch_size / stride / padding / kernel_size are unused in forward().
    B, H, N = 2, 2, 16
    Fin, Fout = 16, 16

    key = jax.random.PRNGKey(0)
    kx, kadj, kw = jax.random.split(key, 3)

    # Deterministic parameter init matching reset_parameters():
    # uniform(-stdv, stdv) with stdv = 1 / sqrt(in_features_per_head)
    stdv = 1.0 / math.sqrt(Fin)
    weight = jax.random.uniform(kw, (H, Fin, Fout), jnp.float32, -stdv, stdv)
    # TODO(synk): bias_gcn param exists in __init__ but is never applied in forward(); omitted.

    x = jax.random.normal(kx, (B, H, N, Fin), jnp.float32)
    adj = (jax.random.uniform(kadj, (B, H, N, N), jnp.float32) > 0.5).astype(jnp.float32)

    out = graph_convolution(x, weight, adj)
    out = jax.block_until_ready(out)

    ref = reference_forward(x, weight, adj)
    assert out.shape == (B, H, N, Fout)
    assert jnp.allclose(out, ref, rtol=1e-5, atol=1e-5)

    print("KERNEL_OK")
</pallas_src>

<mosaic_0001>
module attributes {stable_mosaic.version = 11 : i64} {
  func.func @gcn_kernel(%arg0: i32, %arg1: memref<2x2x16x16xf32, #tpu.memory_space<vmem>>, %arg2: memref<2x16x16xf32, #tpu.memory_space<vmem>>, %arg3: memref<2x2x16x16xf32, #tpu.memory_space<vmem>>, %arg4: memref<2x2x16x16xf32, #tpu.memory_space<vmem>>) attributes {dimension_semantics = [#tpu.dimension_semantics<arbitrary>], iteration_bounds = array<i64: 1>, scalar_prefetch = 0 : i64, scratch_operands = 0 : i64, tpu.core_type = #tpu.core_type<tc>, window_params = [{pipeline_mode = #tpu.pipeline_mode<synchronous>, transform_indices = @transform_0, window_bounds = array<i64: 2, 2, 16, 16>}, {pipeline_mode = #tpu.pipeline_mode<synchronous>, transform_indices = @transform_1, window_bounds = array<i64: 2, 16, 16>}, {pipeline_mode = #tpu.pipeline_mode<synchronous>, transform_indices = @transform_2, window_bounds = array<i64: 2, 2, 16, 16>}, {pipeline_mode = #tpu.pipeline_mode<synchronous>, transform_indices = @transform_3, window_bounds = array<i64: 2, 2, 16, 16>}]} {
    %c0 = arith.constant 0 : index
    %c0_0 = arith.constant 0 : index
    %c0_1 = arith.constant 0 : index
    %c0_2 = arith.constant 0 : index
    %0 = vector.load %arg1[%c0, %c0_0, %c0_1, %c0_2] : memref<2x2x16x16xf32, #tpu.memory_space<vmem>>, vector<2x2x16x16xf32>
    %c0_3 = arith.constant 0 : index
    %c0_4 = arith.constant 0 : index
    %c0_5 = arith.constant 0 : index
    %c0_6 = arith.constant 0 : index
    %1 = vector.load %arg3[%c0_3, %c0_4, %c0_5, %c0_6] : memref<2x2x16x16xf32, #tpu.memory_space<vmem>>, vector<2x2x16x16xf32>
    %2 = vector.shape_cast %1 : vector<2x2x16x16xf32> to vector<4x16x16xf32>
    %cst = arith.constant dense<0.000000e+00> : vector<4x16xf32>
    %3 = vector.multi_reduction <add>, %2, %cst [2] : vector<4x16x16xf32> to vector<4x16xf32>
    %4 = vector.shape_cast %3 : vector<4x16xf32> to vector<4x16x1xf32>
    %cst_7 = arith.constant 1.000000e+00 : f32
    %5 = vector.broadcast %cst_7 : f32 to vector<4x16x1xf32>
    %6 = arith.addf %4, %5 : vector<4x16x1xf32>
    %7 = math.rsqrt %6 : vector<4x16x1xf32>
    %8 = math.absf %7 : vector<4x16x1xf32>
    %cst_8 = arith.constant 0x7F800000 : f32
    %9 = vector.broadcast %cst_8 : f32 to vector<4x16x1xf32>
    %10 = arith.cmpf oeq, %8, %9 : vector<4x16x1xf32>
    %cst_9 = arith.constant 0.000000e+00 : f32
    %11 = vector.broadcast %cst_9 : f32 to vector<4x16x1xf32>
    %12 = arith.select %10, %11, %7 : vector<4x16x1xi1>, vector<4x16x1xf32>
    %13 = vector.extract_strided_slice %0 {offsets = [0, 0, 0, 0], sizes = [2, 1, 16, 16], strides = [1, 1, 1, 1]} : vector<2x2x16x16xf32> to vector<2x1x16x16xf32>
    %14 = vector.shape_cast %13 : vector<2x1x16x16xf32> to vector<2x16x16xf32>
    %15 = vector.shape_cast %14 : vector<2x16x16xf32> to vector<32x16xf32>
    %c0_10 = arith.constant 0 : index
    %c0_11 = arith.constant 0 : index
    %c0_12 = arith.constant 0 : index
    %16 = vector.load %arg2[%c0_10, %c0_11, %c0_12] : memref<2x16x16xf32, #tpu.memory_space<vmem>>, vector<1x16x16xf32>
    %17 = vector.shape_cast %16 : vector<1x16x16xf32> to vector<16x16xf32>
    %cst_13 = arith.constant dense<0.000000e+00> : vector<32x16xf32>
    %18 = tpu.matmul %15, %17, %cst_13 {dimension_numbers = #tpu.dot_dimension_numbers<[1], [0], [0], [1], [0, 0, 1, 1], [], []>} : vector<32x16xf32>, vector<16x16xf32>, vector<32x16xf32> -> vector<32x16xf32>
    %19 = vector.shape_cast %18 : vector<32x16xf32> to vector<2x16x16xf32>
    %20 = vector.extract_strided_slice %0 {offsets = [0, 1, 0, 0], sizes = [2, 1, 16, 16], strides = [1, 1, 1, 1]} : vector<2x2x16x16xf32> to vector<2x1x16x16xf32>
    %21 = vector.shape_cast %20 : vector<2x1x16x16xf32> to vector<2x16x16xf32>
    %22 = vector.shape_cast %21 : vector<2x16x16xf32> to vector<32x16xf32>
    %c1 = arith.constant 1 : index
    %c0_14 = arith.constant 0 : index
    %c0_15 = arith.constant 0 : index
    %23 = vector.load %arg2[%c1, %c0_14, %c0_15] : memref<2x16x16xf32, #tpu.memory_space<vmem>>, vector<1x16x16xf32>
    %24 = vector.shape_cast %23 : vector<1x16x16xf32> to vector<16x16xf32>
    %cst_16 = arith.constant dense<0.000000e+00> : vector<32x16xf32>
    %25 = tpu.matmul %22, %24, %cst_16 {dimension_numbers = #tpu.dot_dimension_numbers<[1], [0], [0], [1], [0, 0, 1, 1], [], []>} : vector<32x16xf32>, vector<16x16xf32>, vector<32x16xf32> -> vector<32x16xf32>
    %26 = vector.shape_cast %25 : vector<32x16xf32> to vector<2x16x16xf32>
    %27 = vector.shape_cast %19 : vector<2x16x16xf32> to vector<2x1x16x16xf32>
    %28 = vector.shape_cast %26 : vector<2x16x16xf32> to vector<2x1x16x16xf32>
    %29 = tpu.concatenate %27, %28 in 1 : vector<2x1x16x16xf32>, vector<2x1x16x16xf32> -> vector<2x2x16x16xf32>
    %30 = vector.shape_cast %29 : vector<2x2x16x16xf32> to vector<4x16x16xf32>
    %31 = vector.broadcast %12 : vector<4x16x1xf32> to vector<4x16x16xf32>
    %32 = arith.mulf %31, %30 : vector<4x16x16xf32>
    "tpu.trace_start"() <{level = 10 : i32, message = "gnm,gmf->gnf"}> : () -> ()
    %cst_17 = arith.constant dense<0.000000e+00> : vector<4x16x16xf32>
    %33 = tpu.matmul %2, %32, %cst_17 {dimension_numbers = #tpu.dot_dimension_numbers<[2], [1], [1], [2], [0, 0, 0, 1, 1, 2], [0], [0]>} : vector<4x16x16xf32>, vector<4x16x16xf32>, vector<4x16x16xf32> -> vector<4x16x16xf32>
    "tpu.trace_stop"() : () -> ()
    %34 = arith.addf %33, %32 : vector<4x16x16xf32>
    %35 = vector.broadcast %12 : vector<4x16x1xf32> to vector<4x16x16xf32>
    %36 = arith.mulf %35, %34 : vector<4x16x16xf32>
    %37 = vector.shape_cast %36 : vector<4x16x16xf32> to vector<2x2x16x16xf32>
    %c0_18 = arith.constant 0 : index
    %c0_19 = arith.constant 0 : index
    %c0_20 = arith.constant 0 : index
    %c0_21 = arith.constant 0 : index
    %38 = vector.load %arg4[%c0_18, %c0_19, %c0_20, %c0_21] : memref<2x2x16x16xf32, #tpu.memory_space<vmem>>, vector<2x2x16x16xf32>
    tpu.vector_store %arg4[%c0_18, %c0_19, %c0_20, %c0_21], %37 {strides = array<i32>} : memref<2x2x16x16xf32, #tpu.memory_space<vmem>>, vector<2x2x16x16xf32>,
    return
  }
  func.func @transform_0(%arg0: i32) -> (i32, i32, i32, i32) {
    %c0_i32 = arith.constant 0 : i32
    %c0_i32_0 = arith.constant 0 : i32
    %c0_i32_1 = arith.constant 0 : i32
    %c0_i32_2 = arith.constant 0 : i32
    %c0_i32_3 = arith.constant 0 : i32
    return %c0_i32, %c0_i32_0, %c0_i32_1, %c0_i32_2 : i32, i32, i32, i32
  }
  func.func @transform_1(%arg0: i32) -> (i32, i32, i32) {
    %c0_i32 = arith.constant 0 : i32
    %c0_i32_0 = arith.constant 0 : i32
    %c0_i32_1 = arith.constant 0 : i32
    %c0_i32_2 = arith.constant 0 : i32
    return %c0_i32, %c0_i32_0, %c0_i32_1 : i32, i32, i32
  }
  func.func @transform_2(%arg0: i32) -> (i32, i32, i32, i32) {
    %c0_i32 = arith.constant 0 : i32
    %c0_i32_0 = arith.constant 0 : i32
    %c0_i32_1 = arith.constant 0 : i32
    %c0_i32_2 = arith.constant 0 : i32
    %c0_i32_3 = arith.constant 0 : i32
    return %c0_i32, %c0_i32_0, %c0_i32_1, %c0_i32_2 : i32, i32, i32, i32
  }
  func.func @transform_3(%arg0: i32) -> (i32, i32, i32, i32) {
    %c0_i32 = arith.constant 0 : i32
    %c0_i32_0 = arith.constant 0 : i32
    %c0_i32_1 = arith.constant 0 : i32
    %c0_i32_2 = arith.constant 0 : i32
    %c0_i32_3 = arith.constant 0 : i32
    return %c0_i32, %c0_i32_0, %c0_i32_1, %c0_i32_2 : i32, i32, i32, i32
  }
}

</mosaic_0001>

<bundles_post_ra>
// kernel: tpu_custom_call.1
= control target key start
LH: loop header
LB: loop body
LE: loop exit
PB: predicated region body
PF: predicated region fallthrough
CT: control target
= control target key end

     0   :  { %8 = vsyncpa [#allocation3], 0  ;;  %s797_s0 = inlined_call_operand.hbm [shape: f32[2,2,16,16], index: 0, kind: input, shape index: {}]   ;;  %s798_s1 = inlined_call_operand.hbm [shape: f32[2,16,16], index: 1, kind: input, shape index: {}]   ;;  %s799_s2 = inlined_call_operand.hbm [shape: f32[2,2,16,16], index: 2, kind: input, shape index: {}]   ;;  %s800_s3 = inlined_call_operand.hbm [shape: f32[2,2,16,16], index: 3, kind: output, shape index: {}]  }
   0x1   :  { %9 = vsyncpa [#allocation6], 0 }
   0x2   :  { %10 = vsyncpa [#allocation4], 0  ;;  %s28_s14 = sshll.u32 %s798_s1, 4  ;;  %s602_s15 = smov [#allocation5]   ;;  %s29_s14 = int_to_ptr.hbm [resolvable:$true] %s28_s14 }
   0x3   :  { %s30_s16 = sshll.u32 %s602_s15, 4  ;;  %s15_s19 = sshll.u32 %s797_s0, 4  ;;  %s31_s16 = int_to_ptr.vmem [resolvable:$true] %s30_s16  ;;  %s16_s19 = int_to_ptr.hbm [resolvable:$true] %s15_s19 }
   0x4   :  { %s603_s20 = smov 128   ;;  %s604_s21 = smov 8  }
   0x5   :  { %36 = dma.hbm_to_vmem [thread:$0]  %s29_s14, 512, %s31_s16, [#allocation6], %s603_s20, %s603_s20, %s604_s21  }
   0x6   :  { %s605_s22 = smov [#allocation2]   ;;  %s41_s1 = sshll.u32 %s799_s2, 4  ;;  %s42_s1 = int_to_ptr.hbm [resolvable:$true] %s41_s1 }
   0x7   :  { %s17_s23 = sshll.u32 %s605_s22, 4  ;;  %s606_s0 = smov [#allocation7]   ;;  %s18_s23 = int_to_ptr.vmem [resolvable:$true] %s17_s23 }
   0x8   :  { %23 = dma.hbm_to_vmem [thread:$0]  %s16_s19, 1024, %s18_s23, [#allocation3], %s603_s20, %s603_s20, %s604_s21  }
   0x9   :  { %s43_s26 = sshll.u32 %s606_s0, 4  ;;  %s44_s26 = int_to_ptr.vmem [resolvable:$true] %s43_s26 }
   0xa   :  { %49 = dma.hbm_to_vmem [thread:$0]  %s42_s1, 1024, %s44_s26, [#allocation6], %s603_s20, %s603_s20, %s604_s21  }
   0xb   :  { %596 = dma.done.wait [#allocation3], 1024  }
   0xc   :  { %597 = vsyncadd [#allocation3], 4294966272 }
   0xd   :  { %598 = dma.done.wait [#allocation6], 1536  }
   0xe   :  { %599 = vsyncadd [#allocation6], 4294965760  ;;  %vm78_vm0 = vcmask 130048   ;;  %v216_v0 = vld [vmem:[#allocation5 + $0x8] sm:$0xff]  ;;  %v260_v1 = vld [vmem:[#allocation5 + $0x18] sm:$0xff]  ;;  %s607_s2 = smov [#allocation8]  }
   0xf   :  { %v646_v2 = vld [vmem:[#allocation7 + $0x28] sm:$0xff]  ;;  %243 = vmatpush.msra.mxu0 %v216_v0  ;;  %287 = vmatpush.msra.mxu1 %v260_v1  ;;  %v652_v5 = vld [vmem:[#allocation7] sm:$0xff]  ;;  %v259_v9 = vld [vmem:[#allocation5 + $0x10] sm:$0xff]  ;;  %s446_s27 = sshll.u32 %s607_s2, 4  ;;  %s448_s30 = sshll.u32 %s800_s3, 4  ;;  %s447_s27 = int_to_ptr.vmem [resolvable:$true] %s446_s27  ;;  %s449_s30 = int_to_ptr.hbm [resolvable:$true] %s448_s30 }
  0x10   :  { %v94_v3 = vsel %vm78_vm0, %v646_v2, 0.0  ;;  %v650_v4 = vld [vmem:[#allocation7 + $0x8] sm:$0xff]  ;;  %v215_v6 = vld [vmem:[#allocation5] sm:$0xff]  ;;  %v79_v8 = vsel %vm78_vm0, %v652_v5, 0.0  ;;  %v64_v11 = vld [vmem:[#allocation2 + $0x10] sm:$0xff] }
  0x11   :  { %95 = vadd.xlane.f32.xlu2 %v94_v3  ;;  %v82_v7 = vsel %vm78_vm0, %v650_v4, 0.0  ;;  %v62_v10 = vld [vmem:[#allocation2] sm:$0xff]  ;;  %80 = vadd.xlane.f32.xlu1 %v79_v8  ;;  %v658_v12 = vld [vmem:[#allocation7 + $0x38] sm:$0xff]  ;;  %v664_v14 = vld [vmem:[#allocation7 + $0x10] sm:$0xff] }
  0x12   :  { %83 = vadd.xlane.f32.xlu0 %v82_v7  ;;  %244 = vmatpush.msra.mxu0 %v215_v6  ;;  %v662_v13 = vld [vmem:[#allocation7 + $0x18] sm:$0xff]  ;;  %v100_v15 = vsel %vm78_vm0, %v658_v12, 0.0  ;;  %v85_v17 = vsel %vm78_vm0, %v664_v14, 0.0  ;;  %v63_v18 = vld [vmem:[#allocation2 + $0x8] sm:$0xff]  ;;  %v674_v20 = vld [vmem:[#allocation7 + $0x20] sm:$0xff] }
  0x13   :  { %288 = vmatpush.msra.mxu1 %v259_v9  ;;  %462 = vmatmul.msk.f32.vlgmr.msra.gmra.mxu0 %vm78_vm0, %v62_v10  ;;  %v88_v16 = vsel %vm78_vm0, %v662_v13, 0.0  ;;  %v65_v19 = vld [vmem:[#allocation2 + $0x18] sm:$0xff]  ;;  %v676_v21 = vld [vmem:[#allocation7 + $0x30] sm:$0xff]  ;;  %v91_v22 = vsel %vm78_vm0, %v674_v20, 0.0  ;;  %v66_v24 = vld [vmem:[#allocation2 + $0x20] sm:$0xff] }
  0x14   :  { %466 = vmatmul.msk.f32.vlgmr.msra.gmra.mxu1 %vm78_vm0, %v64_v11  ;;  %v97_v23 = vsel %vm78_vm0, %v676_v21, 0.0  ;;  %v68_v25 = vld [vmem:[#allocation2 + $0x30] sm:$0xff]  ;;  %v67_v26 = vld [vmem:[#allocation2 + $0x28] sm:$0xff]  ;;  %v69_v27 = vld [vmem:[#allocation2 + $0x38] sm:$0xff] }
  0x19   :  { %101 = vadd.xlane.f32.xlu2 %v100_v15  ;;  %86 = vadd.xlane.f32.xlu1 %v85_v17 }
  0x1a   :  { %89 = vadd.xlane.f32.xlu0 %v88_v16 }
  0x1b   :  { %463 = vmatmul.msk.f32.gmra.mxu0 %vm78_vm0, %v63_v18 }
  0x1c   :  { %467 = vmatmul.msk.f32.gmra.mxu1 %vm78_vm0, %v65_v19 }
  0x21   :  { %98 = vadd.xlane.f32.xlu1 %v97_v23 }
  0x22   :  { %92 = vadd.xlane.f32.xlu0 %v91_v22 }
  0x23   :  { %464 = vmatmul.msk.f32.gmra.mxu0 %vm78_vm0, %v66_v24 }
  0x24   :  { %468 = vmatmul.msk.f32.gmra.mxu1 %vm78_vm0, %v68_v25 }
  0x2b   :  { %465 = vmatmul.msk.f32.gmra.mxu0 %vm78_vm0, %v67_v26 }
  0x2c   :  { %469 = vmatmul.msk.f32.gmra.mxu1 %vm78_vm0, %v69_v27 }
  0x84   :  { %v96_v28 = vpop.xlane.xlu2 %95  ;;  %v81_v31 = vpop.xlane.xlu1 %80 }
  0x85   :  { %v108_v29 = vadd.f32 1.0, %v96_v28  ;;  %v84_v30 = vpop.xlane.xlu0 %83  ;;  %v103_v33 = vadd.f32 1.0, %v81_v31 }
  0x86   :  { %v104_v32 = vadd.f32 1.0, %v84_v30 }
  0x87   :  { %484 = vrsqrt.f32 %v108_v29  ;;  %vm167_vm1 = vweird.f32 %v108_v29  ;;  %vm117_vm4 = vweird.f32 %v103_v33 }
  0x88   :  { %486 = vrsqrt.f32 %v104_v32  ;;  %vm127_vm7 = vweird.f32 %v104_v32 }
  0x89   :  { %488 = vrsqrt.f32 %v103_v33 }
  0x8c   :  { %v102_v34 = vpop.xlane.xlu2 %101  ;;  %v87_v38 = vpop.xlane.xlu1 %86 }
  0x8d   :  { %v686_v35 = vpop.eup %484  ;;  %v688_v36 = vadd.f32 1.0, %v102_v34  ;;  %v90_v37 = vpop.xlane.xlu0 %89  ;;  %v693_v42 = vadd.f32 1.0, %v87_v38 }
  0x8e   :  { %v487_v39 = vpop.eup %486  ;;  %v162_v40 = vmul.f32 %v686_v35, %v108_v29  ;;  %v691_v41 = vadd.f32 1.0, %v90_v37  ;;  %vm168_vm3 = vweird.f32 %v686_v35 }
  0x8f   :  { %v489_v43 = vpop.eup %488  ;;  %v122_v44 = vmul.f32 %v487_v39, %v104_v32  ;;  %490 = vrsqrt.f32 %v688_v36  ;;  %vm128_vm5 = vweird.f32 %v487_v39  ;;  %vm719_vm6 = vmor %vm167_vm1, %vm168_vm3  ;;  %vm187_vm10 = vweird.f32 %v688_v36 }
  0x90   :  { %v163_v45 = vmul.f32 %v686_v35, %v162_v40  ;;  %v112_v46 = vmul.f32 %v489_v43, %v103_v33  ;;  %492 = vrsqrt.f32 %v691_v41  ;;  %v699_v48 = vpop.f32.mrf.mxu0  ;;  %vm118_vm2 = vweird.f32 %v489_v43  ;;  %vm129_vm9 = vmor %vm127_vm7, %vm128_vm5 }
  0x91   :  { %v123_v47 = vmul.f32 %v487_v39, %v122_v44  ;;  %494 = vrsqrt.f32 %v693_v42  ;;  %v701_v49 = vpop.f32.mrf.mxu1  ;;  %vm119_vm8 = vmor %vm117_vm4, %vm118_vm2  ;;  %vm147_vm14 = vweird.f32 %v691_v41  ;;  %vm137_vm2 = vweird.f32 %v693_v42 }
  0x92   :  { %v164_v50 = vmul.f32 0.5, %v163_v45  ;;  %v113_v51 = vmul.f32 %v489_v43, %v112_v46 }
  0x93   :  { %v124_v52 = vmul.f32 0.5, %v123_v47 }
  0x94   :  { %v165_v53 = vsub.f32 1.5, %v164_v50  ;;  %v114_v54 = vmul.f32 0.5, %v113_v51  ;;  %v99_v58 = vpop.xlane.xlu1 %98 }
  0x95   :  { %v703_v55 = vpop.eup %490  ;;  %v125_v56 = vsub.f32 1.5, %v124_v52  ;;  %v93_v57 = vpop.xlane.xlu0 %92  ;;  %v710_v63 = vadd.f32 1.0, %v99_v58 }
  0x96   :  { %v493_v59 = vpop.eup %492  ;;  %v115_v60 = vsub.f32 1.5, %v114_v54  ;;  %v182_v61 = vmul.f32 %v703_v55, %v688_v36  ;;  %v708_v62 = vadd.f32 1.0, %v93_v57  ;;  %v166_v9 = vmul.f32 %v686_v35, %v165_v53 }
  0x97   :  { %v495_v0 = vpop.eup %494  ;;  %v142_v1 = vmul.f32 %v493_v59, %v691_v41  ;;  %v126_v3 = vmul.f32 %v487_v39, %v125_v56  ;;  %vm148_vm11 = vweird.f32 %v493_v59  ;;  %vm188_vm13 = vweird.f32 %v703_v55 }
  0x98   :  { %v183_v6 = vmul.f32 %v703_v55, %v182_v61  ;;  %v132_v7 = vmul.f32 %v495_v0, %v693_v42  ;;  %v116_v8 = vmul.f32 %v489_v43, %v115_v60  ;;  %496 = vrsqrt.f32 %v708_v62  ;;  %v249_v15 = vpop.f32.mrf.mxu0  ;;  %vm149_vm3 = vmor %vm147_vm14, %vm148_vm11 }
  0x99   :  { %v143_v11 = vmul.f32 %v493_v59, %v142_v1  ;;  %v293_v16 = vpop.f32.mrf.mxu1  ;;  %498 = vrsqrt.f32 %v710_v63  ;;  %v130_v24 = vsel %vm129_vm9, %v487_v39, %v126_v3  ;;  %v170_v27 = vsel %vm719_vm6, %v686_v35, %v166_v9  ;;  %vm189_vm4 = vmor %vm187_vm10, %vm188_vm13 }
  0x9a   :  { %v184_v17 = vmul.f32 0.5, %v183_v6  ;;  %v133_v18 = vmul.f32 %v495_v0, %v132_v7  ;;  %v120_v19 = vsel %vm119_vm8, %v489_v43, %v116_v8  ;;  %v192_v26 = vand.u32 2147483647, %v130_v24 }
  0x9b   :  { %v144_v22 = vmul.f32 0.5, %v143_v11  ;;  %v191_v23 = vand.u32 2147483647, %v120_v19  ;;  %vm138_vm15 = vweird.f32 %v495_v0  ;;  %v196_v40 = vand.u32 2147483647, %v170_v27 }
  0x9c   :  { %v134_v25 = vmul.f32 0.5, %v133_v18  ;;  %v185_v28 = vsub.f32 1.5, %v184_v17  ;;  %vm200_vm1 = vcmp.eq.f32.partialorder %v192_v26, inf  ;;  %vm139_vm5 = vmor %vm137_vm2, %vm138_vm15  ;;  %vm157_vm6 = vweird.f32 %v708_v62 }
  0x9d   :  { %v145_v29 = vsub.f32 1.5, %v144_v22  ;;  %vm199_vm12 = vcmp.eq.f32.partialorder %v191_v23, inf  ;;  %v736_v33 = vsel %vm200_vm1, 0.0, %v130_v24  ;;  %vm754_vm8 = vcmp.eq.f32.partialorder %v196_v40, inf }
  0x9e   :  { %v135_v30 = vsub.f32 1.5, %v134_v25  ;;  %v497_v31 = vpop.eup %496  ;;  %v734_v32 = vsel %vm199_vm12, 0.0, %v120_v19  ;;  %v741_v39 = vmul.f32 %v249_v15, %v736_v33  ;;  %v186_v45 = vmul.f32 %v703_v55, %v185_v28 }
  0x9f   :  { %v146_v34 = vmul.f32 %v493_v59, %v145_v29  ;;  %v499_v35 = vpop.eup %498  ;;  %v152_v38 = vmul.f32 %v497_v31, %v708_v62  ;;  %v302_v46 = vmul.f32 %v699_v48, %v734_v32  ;;  %vm158_vm10 = vweird.f32 %v497_v31 }
  0xa0   :  { %v136_v37 = vmul.f32 %v495_v0, %v135_v30  ;;  %v172_v41 = vmul.f32 %v499_v35, %v710_v63  ;;  %v252_v43 = vpop.f32.mrf.mxu0  ;;  %330 = vmatpush.msra.mxu2 %v741_v39  ;;  %v190_v53 = vsel %vm189_vm4, %v703_v55, %v186_v45  ;;  %vm177_vm12 = vweird.f32 %v710_v63  ;;  %vm159_vm14 = vmor %vm157_vm6, %vm158_vm10 }
  0xa1   :  { %v150_v42 = vsel %vm149_vm3, %v493_v59, %v146_v34  ;;  %v296_v44 = vpop.f32.mrf.mxu1  ;;  %v153_v50 = vmul.f32 %v497_v31, %v152_v38  ;;  %v198_v57 = vand.u32 2147483647, %v190_v53  ;;  %vm178_vm13 = vweird.f32 %v499_v35 }
  0xa2   :  { %v140_v47 = vsel %vm139_vm5, %v495_v0, %v136_v37  ;;  %v194_v51 = vand.u32 2147483647, %v150_v42  ;;  %v173_v36 = vmul.f32 %v499_v35, %v172_v41  ;;  %331 = vmatpush.msra.mxu2 %v302_v46  ;;  %v212_v6 = vsel %vm754_vm8, 0.0, %v170_v27  ;;  %vm179_vm15 = vmor %vm177_vm12, %vm178_vm13 }
  0xa3   :  { %v193_v52 = vand.u32 2147483647, %v140_v47  ;;  %v154_v54 = vmul.f32 0.5, %v153_v50  ;;  %470 = vmatmul.msk.f32.vlgmr.msra.gmra.mxu2 %vm78_vm0, %v652_v5  ;;  %vm206_vm11 = vcmp.eq.f32.partialorder %v198_v57, inf }
  0xa4   :  { %vm202_vm7 = vcmp.eq.f32.partialorder %v194_v51, inf  ;;  %v174_v48 = vmul.f32 0.5, %v173_v36  ;;  %v214_v7 = vsel %vm206_vm11, 0.0, %v190_v53 }
  0xa5   :  { %vm201_vm9 = vcmp.eq.f32.partialorder %v193_v52, inf  ;;  %v210_v58 = vsel %vm202_vm7, 0.0, %v150_v42  ;;  %v155_v60 = vsub.f32 1.5, %v154_v54 }
  0xa6   :  { %v209_v59 = vsel %vm201_vm9, 0.0, %v140_v47  ;;  %v305_v61 = vmul.f32 %v293_v16, %v210_v58  ;;  %v175_v55 = vsub.f32 1.5, %v174_v48 }
  0xa7   :  { %v304_v0 = vmul.f32 %v701_v49, %v209_v59  ;;  %v156_v1 = vmul.f32 %v497_v31, %v155_v60 }
  0xa8   :  { %359 = vmatpush.msra.mxu3 %v305_v61  ;;  %v176_v3 = vmul.f32 %v499_v35, %v175_v55  ;;  %v255_v5 = vpop.f32.mrf.mxu0 }
  0xa9   :  { %v299_v8 = vpop.f32.mrf.mxu1  ;;  %v160_v9 = vsel %vm159_vm14, %v497_v31, %v156_v1  ;;  %v307_v10 = vmul.f32 %v255_v5, %v212_v6 }
  0xaa   :  { %v309_v11 = vmul.f32 %v299_v8, %v214_v7  ;;  %360 = vmatpush.msra.mxu3 %v304_v0  ;;  %v195_v63 = vand.u32 2147483647, %v160_v9  ;;  %v180_v15 = vsel %vm179_vm15, %v499_v35, %v176_v3 }
  0xab   :  { %472 = vmatmul.msk.f32.vlgmr.msra.gmra.mxu3 %vm78_vm0, %v664_v14  ;;  %v197_v49 = vand.u32 2147483647, %v180_v15  ;;  %388 = vmatpush.msrb.mxu2 %v307_v10 }
  0xac   :  { %417 = vmatpush.msrb.mxu3 %v309_v11  ;;  %vm203_vm1 = vcmp.eq.f32.partialorder %v195_v63, inf  ;;  %471 = vmatmul.msk.f32.gmra.mxu2 %vm78_vm0, %v650_v4 }
  0xad   :  { %v211_v62 = vsel %vm203_vm1, 0.0, %v160_v9  ;;  %vm205_vm2 = vcmp.eq.f32.partialorder %v197_v49, inf }
  0xae   :  { %v306_v16 = vmul.f32 %v252_v43, %v211_v62  ;;  %v213_v17 = vsel %vm205_vm2, 0.0, %v180_v15 }
  0xaf   :  { %v308_v18 = vmul.f32 %v296_v44, %v213_v17 }
  0xb0   :  { %389 = vmatpush.msrb.mxu2 %v306_v16 }
  0xb1   :  { %418 = vmatpush.msrb.mxu3 %v308_v18 }
  0xb3   :  { %473 = vmatmul.msk.f32.gmra.mxu3 %vm78_vm0, %v662_v13 }
  0xb4   :  { %474 = vmatmul.msk.f32.vlgmr.msrb.gmra.mxu2 %vm78_vm0, %v674_v20 }
  0xbb   :  { %476 = vmatmul.msk.f32.vlgmr.msrb.gmra.mxu3 %vm78_vm0, %v676_v21 }
  0xbc   :  { %475 = vmatmul.msk.f32.gmra.mxu2 %vm78_vm0, %v646_v2 }
  0xc3   :  { %477 = vmatmul.msk.f32.gmra.mxu3 %vm78_vm0, %v658_v12 }
 0x126   :  { %v333_v4 = vpop.f32.mrf.mxu2 }
 0x127   :  { %v334_v14 = vadd.f32 %v333_v4, %v302_v46 }
 0x129   :  { %v426_v19 = vmul.f32 %v334_v14, %v734_v32 }
 0x12b   :  { %434 = vst.msk [vmem:[#allocation8] sm:$0xff] %vm78_vm0, %v426_v19 }
 0x12e   :  { %v362_v22 = vpop.f32.mrf.mxu3 }
 0x12f   :  { %v363_v13 = vadd.f32 %v362_v22, %v304_v0  ;;  %v336_v23 = vpop.f32.mrf.mxu2 }
 0x130   :  { %v337_v20 = vadd.f32 %v336_v23, %v741_v39 }
 0x131   :  { %v428_v24 = vmul.f32 %v363_v13, %v209_v59 }
 0x132   :  { %v427_v21 = vmul.f32 %v337_v20, %v736_v33 }
 0x133   :  { %436 = vst.msk [vmem:[#allocation8 + $0x10] sm:$0xff] %vm78_vm0, %v428_v24 }
 0x134   :  { %435 = vst.msk [vmem:[#allocation8 + $0x8] sm:$0xff] %vm78_vm0, %v427_v21 }
 0x136   :  { %v365_v2 = vpop.f32.mrf.mxu3 }
 0x137   :  { %v366_v12 = vadd.f32 %v365_v2, %v305_v61  ;;  %v391_v25 = vpop.f32.mrf.mxu2 }
 0x138   :  { %v392_v27 = vadd.f32 %v391_v25, %v306_v16 }
 0x139   :  { %v429_v26 = vmul.f32 %v366_v12, %v210_v58 }
 0x13a   :  { %v430_v28 = vmul.f32 %v392_v27, %v211_v62 }
 0x13b   :  { %437 = vst.msk [vmem:[#allocation8 + $0x18] sm:$0xff] %vm78_vm0, %v429_v26 }
 0x13c   :  { %438 = vst.msk [vmem:[#allocation8 + $0x20] sm:$0xff] %vm78_vm0, %v430_v28 }
 0x13e   :  { %v420_v29 = vpop.f32.mrf.mxu3 }
 0x13f   :  { %v421_v30 = vadd.f32 %v420_v29, %v308_v18  ;;  %v394_v31 = vpop.f32.mrf.mxu2 }
 0x140   :  { %v395_v32 = vadd.f32 %v394_v31, %v307_v10 }
 0x141   :  { %v432_v34 = vmul.f32 %v421_v30, %v213_v17 }
 0x142   :  { %v431_v33 = vmul.f32 %v395_v32, %v212_v6 }
 0x143   :  { %440 = vst.msk [vmem:[#allocation8 + $0x30] sm:$0xff] %vm78_vm0, %v432_v34 }
 0x144   :  { %439 = vst.msk [vmem:[#allocation8 + $0x28] sm:$0xff] %vm78_vm0, %v431_v33 }
 0x146   :  { %v423_v35 = vpop.f32.mrf.mxu3 }
 0x147   :  { %v424_v37 = vadd.f32 %v423_v35, %v309_v11 }
 0x149   :  { %v433_v38 = vmul.f32 %v424_v37, %v214_v7 }
 0x14b   :  { %441 = vst.msk [vmem:[#allocation8 + $0x38] sm:$0xff] %vm78_vm0, %v433_v38 }
 0x14c   :  { %454 = dma.vmem_to_hbm [thread:$0]  %s447_s27, 1024, %s449_s30, [#allocation4], %s603_s20, %s603_s20, %s604_s21  }
 0x14d   :  { %600 = dma.done.wait [#allocation4], 1024  }
 0x14e   :  { %601 = vsyncadd [#allocation4], 4294966272 }
 0x14f   :  { %459 = vsyncpa [#allocation3], 1 }
 0x150   :  { %460 = vsyncpa [#allocation6], 1 }
 0x151   :  { %461 = vsyncpa [#allocation4], 1 }

</bundles_post_ra>
